<compile_context>
chip_gen: v6e
topology: v6e:2x2x1
jax: 0.10.0
libtpu: 0.0.40
codegen_flags: <defaults>
</compile_context>

<pallas_src>
import functools
import math

import jax
import jax.numpy as jnp
from jax.experimental import pallas as pl
from jax.experimental.pallas import tpu as pltpu


def _round_up(a, b):
    return -(-a // b) * b


def _dytanh_kernel(alpha_ref, wb_ref, x_ref, o_ref, *, params_on_rows):
    # alpha_ref: (1,) f32 in SMEM
    # wb_ref packs weight (index 0) and bias (index 1):
    #   channels_last  : shape (2, L)   -> broadcast along rows (sublanes)
    #   channels_first : shape (TM, 2)  -> broadcast along lanes
    # x_ref / o_ref: (TM, L)
    a = alpha_ref[0]
    x = x_ref[...].astype(jnp.float32)
    if params_on_rows:
        w = wb_ref[:, 0:1]
        b = wb_ref[:, 1:2]
    else:
        w = wb_ref[0:1, :]
        b = wb_ref[1:2, :]
    o_ref[...] = (jnp.tanh(a * x) * w + b).astype(o_ref.dtype)


def _vmem_budget():
    """(target x-block bytes, vmem_limit_bytes), generation aware.

    128 MiB VMEM parts (v5e/v6e): 4 MiB blocks amortize per-step overhead a
    bit more at zero risk.  64 MiB parts (v7x) / unknown: stay at 2 MiB.
    """
    try:
        info = pltpu.get_tpu_info()
        cap = getattr(info, "vmem_capacity_bytes", None)
        if cap is None:
            cap = getattr(info, "vmem_bytes", None)
        if cap is not None and int(cap) >= 128 * 1024 * 1024:
            return 4 << 20, 64 * 1024 * 1024
    except Exception:
        pass
    return 2 << 20, 32 * 1024 * 1024


def _pick_tm(rows, lane, itemsize, target_bytes):
    """Row-tile size.

    - sized in bytes of the actual dtype (dtype-aware),
    - aligned to the sublane packing factor (8 f32 / 16 bf16 / 32 int8),
    - split into >=2 blocks for mid-size tensors so a 2-TC part (v7x) can
      shard the ('parallel',) grid; ragged last block is masked by Pallas.
    """
    align = max(8, 32 // max(1, int(itemsize)))
    row_bytes = lane * itemsize
    tm = (target_bytes // max(1, row_bytes)) // align * align
    tm = max(align, min(4096, tm))
    if rows <= tm:
        if rows >= 2 * align:
            tm = _round_up(-(-rows // 2), align)  # 2 blocks
        else:
            tm = rows  # single full-height block (block dim == full array dim)
    return tm


def _dytanh_call(x2, alpha1, wb, params_on_rows, target_bytes, vmem_limit):
    rows, L = x2.shape
    itemsize = x2.dtype.itemsize
    TM = _pick_tm(rows, L, itemsize, target_bytes)
    grid = (pl.cdiv(rows, TM),)

    if params_on_rows:
        wb_spec = pl.BlockSpec((TM, 2), lambda i: (i, 0))
    else:
        wb_spec = pl.BlockSpec((2, L), lambda i: (0, 0))

    n = rows * L
    cost = pl.CostEstimate(
        flops=3 * n,
        transcendentals=n,
        bytes_accessed=2 * n * itemsize + wb.size * 4 + 4,
    )

    return pl.pallas_call(
        functools.partial(_dytanh_kernel, params_on_rows=params_on_rows),
        out_shape=jax.ShapeDtypeStruct((rows, L), x2.dtype),
        grid=grid,
        in_specs=[
            pl.BlockSpec(memory_space=pltpu.MemorySpace.SMEM),  # alpha scalar
            wb_spec,                                            # packed weight/bias
            pl.BlockSpec((TM, L), lambda i: (i, 0)),            # x tile
        ],
        out_specs=pl.BlockSpec((TM, L), lambda i: (i, 0)),
        compiler_params=pltpu.CompilerParams(
            dimension_semantics=("parallel",),
            vmem_limit_bytes=vmem_limit,
        ),
        cost_estimate=cost,
    )(alpha1, wb, x2)


class DynamicTanh:
    """JAX/Pallas equivalent of DynamicTanh.forward (the wrapped module)."""

    def __init__(self, alpha, weight, bias, channels_last):
        self.alpha = jnp.asarray(alpha, jnp.float32).reshape(1)
        self.weight = jnp.asarray(weight, jnp.float32)
        self.bias = jnp.asarray(bias, jnp.float32)
        self.channels_last = channels_last
        self._wb_cache = {}  # hoisted param tiles, keyed by layout
        self._target_bytes, self._vmem_limit = _vmem_budget()

    # ---- channels_last: weight/bias broadcast over the last dim ----
    def _forward_channels_last(self, x):
        C = self.weight.shape[-1]
        assert x.shape[-1] == C
        orig_shape = x.shape
        total = x.size
        base = math.lcm(C, 128)
        pad = 0
        if total % base == 0:
            L = base
            while L * 2 <= 2048 and total % (L * 2) == 0:
                L *= 2
            x2 = x.reshape(-1, L)
        elif base <= 8192:
            # Pad the flat stream to a 128-aligned lane width -> unmasked
            # stores; slice the tail back off afterwards.
            L = base
            pad = (-total) % base
            x2 = jnp.pad(x.reshape(-1), (0, pad)).reshape(-1, L)
        else:
            # Very large / awkward C: channel axis straight on lanes; the
            # masked tail store is a negligible fraction of each row.
            L = C
            x2 = x.reshape(-1, C)

        key = ("cl", L)
        wb = self._wb_cache.get(key)
        if wb is None:
            reps = L // C
            wb = jnp.stack(
                [jnp.tile(self.weight, reps), jnp.tile(self.bias, reps)], axis=0
            )  # (2, L)
            self._wb_cache[key] = wb

        out2 = _dytanh_call(x2, self.alpha, wb, False,
                            self._target_bytes, self._vmem_limit)
        if pad:
            out2 = out2.reshape(-1)[:total]
        return out2.reshape(orig_shape)

    # ---- channels_first: NCHW, weight/bias broadcast as w[:, None, None] ----
    def _forward_channels_first(self, x):
        C = self.weight.shape[-1]
        N, Cx, H, W = x.shape
        assert Cx == C
        HW = H * W
        Lp = _round_up(HW, 128)           # lane-dense spatial extent
        L = 128
        while L * 2 <= 2048 and Lp % (L * 2) == 0:
            L *= 2
        rows_per_nc = Lp // L             # split huge H*W across rows

        x2 = x.reshape(N * C, HW)
        if Lp != HW:
            x2 = jnp.pad(x2, ((0, 0), (0, Lp - HW)))
        x2 = x2.reshape(N * C * rows_per_nc, L)

        key = ("cf", N, rows_per_nc)
        wb = self._wb_cache.get(key)
        if wb is None:
            w_col = jnp.tile(jnp.repeat(self.weight, rows_per_nc), N)
            b_col = jnp.tile(jnp.repeat(self.bias, rows_per_nc), N)
            wb = jnp.stack([w_col, b_col], axis=1)  # (rows, 2) packed
            self._wb_cache[key] = wb

        out2 = _dytanh_call(x2, self.alpha, wb, True,
                            self._target_bytes, self._vmem_limit)
        out2 = out2.reshape(N * C, Lp)
        if Lp != HW:
            out2 = out2[:, :HW]
        return out2.reshape(N, C, H, W)

    def __call__(self, x):
        if self.channels_last:
            return self._forward_channels_last(x)
        return self._forward_channels_first(x)


class Ignore2ndArg:
    """Python-side equivalent of the PyTorch Ignore2ndArg wrapper: the 2nd
    argument only exists to satisfy gradient checkpointing and is ignored.
    No compute -> no kernel needed for the wrapper itself."""

    def __init__(self, module_fn):
        self.module_fn = module_fn

    def __call__(self, x, dummy_arg=None):
        assert dummy_arg is not None
        return self.module_fn(x)


def _reference(x, alpha, weight, bias, channels_last):
    y = jnp.tanh(alpha * x)
    if channels_last:
        return y * weight + bias
    else:
        return y * weight[:, None, None] + bias[:, None, None]


if __name__ == "__main__":
    key = jax.random.PRNGKey(0)
    k1, k2 = jax.random.split(key)

    alpha_init_value = 0.5
    alpha = jnp.float32(alpha_init_value)
    dummy = jnp.zeros((1,), jnp.float32)  # the ignored 2nd argument

    # --- channels_first (NCHW): batch=2, C=4, 16x16 spatial ---
    C = 4
    weight = jnp.ones((C,), jnp.float32) * 1.25
    bias = jnp.zeros((C,), jnp.float32) + 0.1
    x_nchw = jax.random.normal(k1, (2, C, 16, 16), jnp.float32)

    mod_cf = Ignore2ndArg(DynamicTanh(alpha, weight, bias, channels_last=False))
    out_cf = mod_cf(x_nchw, dummy_arg=dummy)
    jax.block_until_ready(out_cf)
    ref_cf = _reference(x_nchw, alpha, weight, bias, channels_last=False)
    assert out_cf.shape == x_nchw.shape and out_cf.dtype == x_nchw.dtype
    assert jnp.allclose(out_cf, ref_cf, atol=1e-5, rtol=1e-5)

    # second call exercises the hoisted/cached param-tile path
    out_cf2 = mod_cf(x_nchw, dummy_arg=dummy)
    jax.block_until_ready(out_cf2)
    assert jnp.allclose(out_cf2, ref_cf, atol=1e-5, rtol=1e-5)

    # --- channels_last: batch=2, seq=8, hidden=32 ---
    Hd = 32
    weight_cl = jnp.ones((Hd,), jnp.float32) * 0.75
    bias_cl = jnp.zeros((Hd,), jnp.float32) - 0.2
    x_cl = jax.random.normal(k2, (2, 8, Hd), jnp.float32)

    mod_cl = Ignore2ndArg(DynamicTanh(alpha, weight_cl, bias_cl, channels_last=True))
    out_cl = mod_cl(x_cl, dummy_arg=dummy)
    jax.block_until_ready(out_cl)
    ref_cl = _reference(x_cl, alpha, weight_cl, bias_cl, channels_last=True)
    assert out_cl.shape == x_cl.shape and out_cl.dtype == x_cl.dtype
    assert jnp.allclose(out_cl, ref_cl, atol=1e-5, rtol=1e-5)

    # TODO(synk): PyTorch-side checkpoint()/requires_grad plumbing that
    # motivates Ignore2ndArg has no Pallas equivalent; the wrapper here only
    # reproduces the forward semantics (assert + ignore dummy_arg).
    print("KERNEL_OK")
</pallas_src>

<mosaic_0001>
module attributes {stable_mosaic.version = 11 : i64} {
  func.func @_dytanh_kernel(%arg0: i32, %arg1: memref<1xf32, #tpu.memory_space<smem>>, %arg2: memref<8x2xf32, #tpu.memory_space<vmem>>, %arg3: memref<8x256xf32, #tpu.memory_space<vmem>>, %arg4: memref<8x256xf32, #tpu.memory_space<vmem>>) attributes {dimension_semantics = [#tpu.dimension_semantics<parallel>], iteration_bounds = array<i64: 1>, scalar_prefetch = 0 : i64, scratch_operands = 0 : i64, tpu.core_type = #tpu.core_type<tc>, window_params = [{transform_indices = @transform_0, window_bounds = array<i64: 1>}, {transform_indices = @transform_1, window_bounds = array<i64: 8, 2>}, {transform_indices = @transform_2, window_bounds = array<i64: 8, 256>}, {transform_indices = @transform_3, window_bounds = array<i64: 8, 256>}]} {
    %c0 = arith.constant 0 : index
    %0 = memref.load %arg1[%c0] : memref<1xf32, #tpu.memory_space<smem>>
    %c0_0 = arith.constant 0 : index
    %c0_1 = arith.constant 0 : index
    %1 = vector.load %arg3[%c0_0, %c0_1] : memref<8x256xf32, #tpu.memory_space<vmem>>, vector<8x256xf32>
    %c0_2 = arith.constant 0 : index
    %c0_3 = arith.constant 0 : index
    %2 = vector.load %arg2[%c0_2, %c0_3] : memref<8x2xf32, #tpu.memory_space<vmem>>, vector<8x1xf32>
    %c0_4 = arith.constant 0 : index
    %c1 = arith.constant 1 : index
    %3 = vector.load %arg2[%c0_4, %c1] : memref<8x2xf32, #tpu.memory_space<vmem>>, vector<8x1xf32>
    %4 = vector.broadcast %0 : f32 to vector<8x256xf32>
    %5 = arith.mulf %4, %1 : vector<8x256xf32>
    %6 = math.tanh %5 : vector<8x256xf32>
    %7 = vector.broadcast %2 : vector<8x1xf32> to vector<8x256xf32>
    %8 = arith.mulf %6, %7 : vector<8x256xf32>
    %9 = vector.broadcast %3 : vector<8x1xf32> to vector<8x256xf32>
    %10 = arith.addf %8, %9 : vector<8x256xf32>
    %c0_5 = arith.constant 0 : index
    %c0_6 = arith.constant 0 : index
    %11 = vector.load %arg4[%c0_5, %c0_6] : memref<8x256xf32, #tpu.memory_space<vmem>>, vector<8x256xf32>
    tpu.vector_store %arg4[%c0_5, %c0_6], %10 {strides = array<i32>} : memref<8x256xf32, #tpu.memory_space<vmem>>, vector<8x256xf32>,
    return
  }
  func.func @transform_0(%arg0: i32) -> i32 {
    %c0_i32 = arith.constant 0 : i32
    %c0_i32_0 = arith.constant 0 : i32
    return %c0_i32 : i32
  }
  func.func @transform_1(%arg0: i32) -> (i32, i32) {
    %c0_i32 = arith.constant 0 : i32
    %c0_i32_0 = arith.constant 0 : i32
    return %arg0, %c0_i32 : i32, i32
  }
  func.func @transform_2(%arg0: i32) -> (i32, i32) {
    %c0_i32 = arith.constant 0 : i32
    %c0_i32_0 = arith.constant 0 : i32
    return %arg0, %c0_i32 : i32, i32
  }
  func.func @transform_3(%arg0: i32) -> (i32, i32) {
    %c0_i32 = arith.constant 0 : i32
    %c0_i32_0 = arith.constant 0 : i32
    return %arg0, %c0_i32 : i32, i32
  }
}

</mosaic_0001>

<bundles_post_ra>
// kernel: tpu_custom_call.1
= control target key start
LH: loop header
LB: loop body
LE: loop exit
PB: predicated region body
PF: predicated region fallthrough
CT: control target
= control target key end

     0   :  { %9 = vsyncpa [#allocation4], 0  ;;  %s157_s0 = inlined_call_operand.<no memory space> [shape: f32[1], index: 0, kind: input, shape index: {}]   ;;  %s158_s1 = inlined_call_operand.vmem [shape: f32[8,2], index: 1, kind: input, shape index: {}]   ;;  %s159_s2 = inlined_call_operand.hbm [shape: f32[8,256], index: 2, kind: input, shape index: {}]   ;;  %s160_s3 = inlined_call_operand.hbm [shape: f32[8,256], index: 3, kind: output, shape index: {}]  }
   0x1   :  { %10 = vsyncpa [#allocation5], 0  ;;  %s121_s12 = smov [#allocation3]  }
   0x2   :  { %s21_s13 = sshll.u32 %s121_s12, 4  ;;  %s22_s13 = int_to_ptr.vmem [resolvable:$true] %s21_s13 }
   0x3   :  { %s85_s14 = scalar_lea.vmem %s22_s13, 256  ;;  %p90_p1 = scmp.lt.s32.totalorder %s22_s13, %s22_s13 }
   0x4   :  { %p86_p0 = scmp.ne.s32.totalorder %s22_s13, %s85_s14  ;;  %p91_p2 = scmp.lt.s32.totalorder %s85_s14, %s85_s14 }
   0x6   :  { %p92_p3 = por %p91_p2, %p90_p1 }
   0x8   :  { %p93_p4 = pnand %p92_p3, %p86_p0 }
   0xa   :  { %96 = shalt.err (!%p93_p4)
}
   0xb   :  { %24 = dma.hbm_to_vmem [thread:$0]  %s159_s2, 256, %s22_s13, [#allocation4]  }
   0xc   :  { %117 = dma.done.wait [#allocation4], 256  }
   0xd   :  { %118 = vsyncadd [#allocation4], 4294967040  ;;  %v122_v0 = vmov 0   ;;  %v31_v1 = vld [vmem:[%s158_s1] sm:$0xff]  ;;  %v123_v2 = vmov 1   ;;  %v32_v3 = vstv %s157_s0  ;;  %v30_v5 = vld [vmem:[#allocation3 + $0x8] sm:$0xff] }
   0xe   :  { %71 = vset.pattern.permute.xlu0 %v122_v0  ;;  %v29_v4 = vld [vmem:[#allocation3] sm:$0xff]  ;;  %v34_v7 = vmul.f32 %v32_v3, %v30_v5  ;;  %s124_s2 = smov [#allocation6]  }
   0xf   :  { %39 = vperm.xlu0 %71, %v31_v1   ;;  %v33_v6 = vmul.f32 %v32_v3, %v29_v4  ;;  %s58_s21 = sshll.u32 %s124_s2, 4  ;;  %s59_s21 = int_to_ptr.vmem [resolvable:$true] %s58_s21 }
  0x10   :  { %s97_s0 = scalar_lea.vmem %s59_s21, 256  ;;  %p102_p6 = scmp.lt.s32.totalorder %s59_s21, %s59_s21 }
  0x11   :  { %73 = vtanh.f32 %v33_v6  ;;  %p98_p5 = scmp.ne.s32.totalorder %s59_s21, %s97_s0  ;;  %p103_p7 = scmp.lt.s32.totalorder %s97_s0, %s97_s0 }
  0x12   :  { %75 = vtanh.f32 %v34_v7 }
  0x13   :  { %72 = vset.pattern.permute.xlu0 %v123_v2  ;;  %p104_p8 = por %p103_p7, %p102_p6 }
  0x14   :  { %45 = vperm.xlu0 %72, %v31_v1  }
  0x15   :  { %p105_p9 = pnand %p104_p8, %p98_p5 }
  0x1e   :  { %v74_v8 = vpop.eup %73 }
  0x1f   :  { %v76_v10 = vpop.eup %75 }
  0x8a   :  { %v40_v9 = vpop.permute.xlu0 %39 }
  0x8b   :  { %v42_v11 = vmul.f32 %v74_v8, %v40_v9  ;;  %v43_v12 = vmul.f32 %v76_v10, %v40_v9 }
  0x8f   :  { %v46_v13 = vpop.permute.xlu0 %45 }
  0x90   :  { %v48_v14 = vadd.f32 %v46_v13, %v42_v11  ;;  %v49_v15 = vadd.f32 %v46_v13, %v43_v12 }
  0x92   :  { %50 = vst [vmem:[#allocation6] sm:$0xff] %v48_v14  ;;  %51 = vst [vmem:[#allocation6 + $0x8] sm:$0xff] %v49_v15 }
  0x93   :  { %108 = shalt.err (!%p105_p9)
}
  0x94   :  { %61 = dma.vmem_to_hbm [thread:$0]  %s59_s21, 256, %s160_s3, [#allocation5]  }
  0x95   :  { %119 = dma.done.wait [#allocation5], 256  }
  0x96   :  { %120 = vsyncadd [#allocation5], 4294967040 }
  0x97   :  { %65 = vsyncpa [#allocation4], 1 }
  0x98   :  { %66 = vsyncpa [#allocation5], 1 }

</bundles_post_ra>
